<compile_context>
chip_gen: v5e
topology: v5e:2x2
jax: 0.10.0
libtpu: 0.0.40
codegen_flags: <defaults>
</compile_context>

<pallas_src>
import functools

import jax
import jax.numpy as jnp
from jax.experimental import pallas as pl
from jax.experimental.pallas import tpu as pltpu


def _round_up(x, m):
    return ((x + m - 1) // m) * m


def _vmem_caps():
    """Generation-aware (limit, tiling-budget) in bytes.

    128-MiB parts (v5e/v6e) -> limit 64 MiB, budget 48 MiB.
    64-MiB parts (v7x)      -> limit 32 MiB, budget 24 MiB.
    Unknown                 -> assume 64 MiB physical (conservative, safe everywhere).
    """
    try:
        cap = int(pltpu.get_tpu_info().vmem_capacity_bytes)
    except Exception:
        cap = 64 * 1024 * 1024
    return cap // 2, (3 * cap) // 8


@functools.lru_cache(maxsize=None)
def _single_buffer_supported():
    """True iff this JAX build accepts pl.Buffered(1) (single-buffered BlockSpec)."""
    def _copy(x_ref, o_ref):
        o_ref[...] = x_ref[...]
    try:
        out = pl.pallas_call(
            _copy,
            out_shape=jax.ShapeDtypeStruct((8, 128), jnp.float32),
            grid=(1,),
            in_specs=[pl.BlockSpec((8, 128), lambda i: (0, 0),
                                   pipeline_mode=pl.Buffered(1))],
            out_specs=pl.BlockSpec((8, 128), lambda i: (0, 0)),
        )(jnp.zeros((8, 128), jnp.float32))
        jax.block_until_ready(out)
        return True
    except Exception:
        return False


def _estimate_slack_kernel(p_ref, f_ref, d_ref, mg_ref, ml_ref, out_ref):
    # Two MXU matmuls with f32 accumulation; no scratch packing / zero-fill.
    # (Second vmatmul push is free on an HBM-bound kernel; removing the packing
    # removes all per-step scratch vst traffic and its VMEM footprint.)
    p = p_ref[...].astype(jnp.float32)
    f = f_ref[...].astype(jnp.float32)
    mg = mg_ref[...].astype(jnp.float32)
    ml = ml_ref[...].astype(jnp.float32)
    combined = jnp.dot(p, mg, preferred_element_type=jnp.float32)
    combined = combined + jnp.dot(f, ml, preferred_element_type=jnp.float32)
    out_ref[...] = (d_ref[...].astype(jnp.float32) - combined).astype(out_ref.dtype)


def prepare_masks(node_to_gen_mask, lineflow_mask, dtype=jnp.float32):
    """One-time (init-style) transpose of the static incidence masks.

    Returns (gen_mask_T [G, N], line_mask_T [L, N]).  Mirrors the PyTorch
    module's __init__ so no per-call transposes hit HBM.  bf16 is exact for
    0/1-valued masks and halves their VMEM residency if desired.
    """
    # TODO(synk): default masks to bf16 (exact for 0/1) once callers sign off;
    # activation bf16 would additionally need a tolerance sign-off.
    n, g = node_to_gen_mask.shape
    n2, l = lineflow_mask.shape
    assert n == n2
    return (jnp.transpose(node_to_gen_mask).astype(dtype),
            jnp.transpose(lineflow_mask).astype(dtype))


def _choose_tiles(b, n, g, l, itemsizes, mask_itemsize, budget, mask_bufs):
    """Pick (tb, tn): batch tile and N tile sizes."""
    p_b, f_b, d_b, o_b = itemsizes
    sub = max(8, 32 // min(itemsizes))          # sublane multiple: 8 f32 / 16 bf16 / 32 i8

    # --- N tile: bound the resident mask slab (matters on v7x's 64 MiB). ---
    mask_col_bytes = (g + l) * mask_itemsize    # mask bytes per column of N
    if mask_bufs * mask_col_bytes * n <= budget // 2:
        tn = n                                  # masks fully VMEM-resident
    else:
        # Stream masks along N in multiple-of-128 tiles (double-buffered).
        tn = max(128, ((budget // 2) // (2 * mask_col_bytes)) // 128 * 128)
        tn = min(tn, n)
        mask_bufs = 2
    # TODO(synk): no K-tiling; assumes (G+L)*tn masks fit VMEM (true for grid-scale shapes).

    # --- Batch tile: biggest tile whose double-buffered streams fit what's left. ---
    resident = mask_bufs * mask_col_bytes * tn
    per_row = 2 * (g * p_b + l * f_b + tn * d_b + tn * o_b)
    avail = max(budget - resident, sub * per_row)
    tb = min(avail // per_row, 1024, b)
    if tb < b:
        tb = max((tb // sub) * sub, sub)

    # --- Ensure several "parallel" batch tiles so v7x's two TCs both get work
    #     (negligible per-step overhead on 1-TC v5e/v6e). ---
    if b >= 4 * sub:
        tb = min(tb, _round_up(pl.cdiv(b, 4), sub))
    elif b >= 2 * sub:
        tb = min(tb, _round_up(pl.cdiv(b, 2), sub))
    return int(tb), int(tn)


def estimate_slack(p_gt, f_lt, D_nt, gen_mask_T, line_mask_T):
    """md_nt = D_nt - (p_gt @ node_to_gen_mask.T + f_lt @ lineflow_mask.T).

    p_gt: [B, G], f_lt: [B, L], D_nt: [B, N],
    gen_mask_T: [G, N], line_mask_T: [L, N] from prepare_masks().  Returns [B, N].
    """
    b, g = p_gt.shape
    b2, l = f_lt.shape
    b3, n = D_nt.shape
    assert b == b2 == b3
    assert gen_mask_T.shape == (g, n) and line_mask_T.shape == (l, n)

    vmem_limit, vmem_budget = _vmem_caps()
    single_buf = _single_buffer_supported()
    itemsizes = (p_gt.dtype.itemsize, f_lt.dtype.itemsize,
                 D_nt.dtype.itemsize, D_nt.dtype.itemsize)
    tb, tn = _choose_tiles(b, n, g, l, itemsizes, gen_mask_T.dtype.itemsize,
                           vmem_budget, 1 if single_buf else 2)
    grid = (pl.cdiv(b, tb), pl.cdiv(n, tn))

    # Constant-index, VMEM-resident masks are DMA'd once; single-buffer them
    # when supported so the second copy's VMEM goes to bigger batch tiles.
    mask_kwargs = {}
    if tn == n and single_buf:
        mask_kwargs["pipeline_mode"] = pl.Buffered(1)

    grid_spec = pltpu.PrefetchScalarGridSpec(
        num_scalar_prefetch=0,
        grid=grid,
        in_specs=[
            pl.BlockSpec((tb, g), lambda i, j: (i, 0)),          # p tile
            pl.BlockSpec((tb, l), lambda i, j: (i, 0)),          # f tile
            pl.BlockSpec((tb, tn), lambda i, j: (i, j)),         # demand tile
            pl.BlockSpec((g, tn), lambda i, j: (0, j), **mask_kwargs),
            pl.BlockSpec((l, tn), lambda i, j: (0, j), **mask_kwargs),
        ],
        out_specs=pl.BlockSpec((tb, tn), lambda i, j: (i, j)),
    )

    cost = pl.CostEstimate(
        flops=2 * b * (g + l) * n,
        transcendentals=0,
        bytes_accessed=(b * (g * itemsizes[0] + l * itemsizes[1]
                             + n * (itemsizes[2] + itemsizes[3]))
                        + (g + l) * n * gen_mask_T.dtype.itemsize),
    )

    return pl.pallas_call(
        _estimate_slack_kernel,
        out_shape=jax.ShapeDtypeStruct((b, n), D_nt.dtype),
        grid_spec=grid_spec,
        compiler_params=pltpu.CompilerParams(
            dimension_semantics=("parallel", "parallel"),
            vmem_limit_bytes=vmem_limit,
        ),
        cost_estimate=cost,
    )(p_gt, f_lt, D_nt, gen_mask_T, line_mask_T)


if __name__ == "__main__":
    # Small, deterministic example shapes.
    B, G, L, N = 2, 8, 12, 16

    key = jax.random.PRNGKey(0)
    k1, k2, k3, k4, k5 = jax.random.split(key, 5)

    p_gt = jax.random.normal(k1, (B, G), dtype=jnp.float32)
    f_lt = jax.random.normal(k2, (B, L), dtype=jnp.float32)
    D_nt = jax.random.normal(k3, (B, N), dtype=jnp.float32)

    # Deterministic synthetic incidence-style masks (0/1 valued).
    node_to_gen_mask = (jax.random.uniform(k4, (N, G)) > 0.5).astype(jnp.float32)
    lineflow_mask = (jax.random.uniform(k5, (N, L)) > 0.5).astype(jnp.float32)

    # Init-time prep (mirrors the PyTorch module's __init__): done once, reused per call.
    gen_mask_T, line_mask_T = prepare_masks(node_to_gen_mask, lineflow_mask)
    gen_mask_T = jax.block_until_ready(gen_mask_T)
    line_mask_T = jax.block_until_ready(line_mask_T)

    md_nt = estimate_slack(p_gt, f_lt, D_nt, gen_mask_T, line_mask_T)
    jax.block_until_ready(md_nt)

    # Reference check in plain JAX (same semantics as the PyTorch forward).
    ref = D_nt - (p_gt @ node_to_gen_mask.T + f_lt @ lineflow_mask.T)
    assert jnp.allclose(md_nt, ref, atol=1e-5, rtol=1e-5), "mismatch vs reference"

    print("KERNEL_OK")
</pallas_src>

<mosaic_0001>
module attributes {stable_mosaic.version = 11 : i64} {
  func.func @_copy(%arg0: i32, %arg1: memref<8x128xf32, #tpu.memory_space<vmem>>, %arg2: memref<8x128xf32, #tpu.memory_space<vmem>>) attributes {dimension_semantics = [#tpu.dimension_semantics<arbitrary>], iteration_bounds = array<i64: 1>, scalar_prefetch = 0 : i64, scratch_operands = 0 : i64, tpu.core_type = #tpu.core_type<tc>, window_params = [{pipeline_mode = #tpu.pipeline_mode<synchronous>, transform_indices = @transform_0, window_bounds = array<i64: 8, 128>}, {pipeline_mode = #tpu.pipeline_mode<synchronous>, transform_indices = @transform_1, window_bounds = array<i64: 8, 128>}]} {
    %c0 = arith.constant 0 : index
    %c0_0 = arith.constant 0 : index
    %0 = vector.load %arg1[%c0, %c0_0] : memref<8x128xf32, #tpu.memory_space<vmem>>, vector<8x128xf32>
    %c0_1 = arith.constant 0 : index
    %c0_2 = arith.constant 0 : index
    %1 = vector.load %arg2[%c0_1, %c0_2] : memref<8x128xf32, #tpu.memory_space<vmem>>, vector<8x128xf32>
    tpu.vector_store %arg2[%c0_1, %c0_2], %0 {strides = array<i32>} : memref<8x128xf32, #tpu.memory_space<vmem>>, vector<8x128xf32>,
    return
  }
  func.func @transform_0(%arg0: i32) -> (i32, i32) {
    %c0_i32 = arith.constant 0 : i32
    %c0_i32_0 = arith.constant 0 : i32
    %c0_i32_1 = arith.constant 0 : i32
    return %c0_i32, %c0_i32_0 : i32, i32
  }
  func.func @transform_1(%arg0: i32) -> (i32, i32) {
    %c0_i32 = arith.constant 0 : i32
    %c0_i32_0 = arith.constant 0 : i32
    %c0_i32_1 = arith.constant 0 : i32
    return %c0_i32, %c0_i32_0 : i32, i32
  }
}

module attributes {stable_mosaic.version = 11 : i64} {
  func.func @_estimate_slack_kernel(%arg0: i32, %arg1: i32, %arg2: memref<2x8xf32, #tpu.memory_space<vmem>>, %arg3: memref<2x12xf32, #tpu.memory_space<vmem>>, %arg4: memref<2x16xf32, #tpu.memory_space<vmem>>, %arg5: memref<8x16xf32, #tpu.memory_space<vmem>>, %arg6: memref<12x16xf32, #tpu.memory_space<vmem>>, %arg7: memref<2x16xf32, #tpu.memory_space<vmem>>) attributes {dimension_semantics = [#tpu.dimension_semantics<parallel>, #tpu.dimension_semantics<parallel>], iteration_bounds = array<i64: 1, 1>, scalar_prefetch = 0 : i64, scratch_operands = 0 : i64, tpu.core_type = #tpu.core_type<tc>, window_params = [{transform_indices = @transform_0, window_bounds = array<i64: 2, 8>}, {transform_indices = @transform_1, window_bounds = array<i64: 2, 12>}, {transform_indices = @transform_2, window_bounds = array<i64: 2, 16>}, {transform_indices = @transform_3, window_bounds = array<i64: 8, 16>}, {transform_indices = @transform_4, window_bounds = array<i64: 12, 16>}, {transform_indices = @transform_5, window_bounds = array<i64: 2, 16>}]} {
    %c0 = arith.constant 0 : index
    %c0_0 = arith.constant 0 : index
    %0 = vector.load %arg2[%c0, %c0_0] : memref<2x8xf32, #tpu.memory_space<vmem>>, vector<2x8xf32>
    %c0_1 = arith.constant 0 : index
    %c0_2 = arith.constant 0 : index
    %1 = vector.load %arg3[%c0_1, %c0_2] : memref<2x12xf32, #tpu.memory_space<vmem>>, vector<2x12xf32>
    %c0_3 = arith.constant 0 : index
    %c0_4 = arith.constant 0 : index
    %2 = vector.load %arg5[%c0_3, %c0_4] : memref<8x16xf32, #tpu.memory_space<vmem>>, vector<8x16xf32>
    %c0_5 = arith.constant 0 : index
    %c0_6 = arith.constant 0 : index
    %3 = vector.load %arg6[%c0_5, %c0_6] : memref<12x16xf32, #tpu.memory_space<vmem>>, vector<12x16xf32>
    %cst = arith.constant dense<0.000000e+00> : vector<2x16xf32>
    %4 = tpu.matmul %0, %2, %cst {dimension_numbers = #tpu.dot_dimension_numbers<[1], [0], [0], [1], [0, 0, 1, 1], [], []>} : vector<2x8xf32>, vector<8x16xf32>, vector<2x16xf32> -> vector<2x16xf32>
    %cst_7 = arith.constant dense<0.000000e+00> : vector<2x16xf32>
    %5 = tpu.matmul %1, %3, %cst_7 {dimension_numbers = #tpu.dot_dimension_numbers<[1], [0], [0], [1], [0, 0, 1, 1], [], []>} : vector<2x12xf32>, vector<12x16xf32>, vector<2x16xf32> -> vector<2x16xf32>
    %6 = arith.addf %4, %5 : vector<2x16xf32>
    %c0_8 = arith.constant 0 : index
    %c0_9 = arith.constant 0 : index
    %7 = vector.load %arg4[%c0_8, %c0_9] : memref<2x16xf32, #tpu.memory_space<vmem>>, vector<2x16xf32>
    %8 = arith.subf %7, %6 : vector<2x16xf32>
    %c0_10 = arith.constant 0 : index
    %c0_11 = arith.constant 0 : index
    %9 = vector.load %arg7[%c0_10, %c0_11] : memref<2x16xf32, #tpu.memory_space<vmem>>, vector<2x16xf32>
    tpu.vector_store %arg7[%c0_10, %c0_11], %8 {strides = array<i32>} : memref<2x16xf32, #tpu.memory_space<vmem>>, vector<2x16xf32>,
    return
  }
  func.func @transform_0(%arg0: i32, %arg1: i32) -> (i32, i32) {
    %c0_i32 = arith.constant 0 : i32
    %c0_i32_0 = arith.constant 0 : i32
    return %arg0, %c0_i32 : i32, i32
  }
  func.func @transform_1(%arg0: i32, %arg1: i32) -> (i32, i32) {
    %c0_i32 = arith.constant 0 : i32
    %c0_i32_0 = arith.constant 0 : i32
    return %arg0, %c0_i32 : i32, i32
  }
  func.func @transform_2(%arg0: i32, %arg1: i32) -> (i32, i32) {
    %c0_i32 = arith.constant 0 : i32
    return %arg0, %arg1 : i32, i32
  }
  func.func @transform_3(%arg0: i32, %arg1: i32) -> (i32, i32) {
    %c0_i32 = arith.constant 0 : i32
    %c0_i32_0 = arith.constant 0 : i32
    return %c0_i32, %arg1 : i32, i32
  }
  func.func @transform_4(%arg0: i32, %arg1: i32) -> (i32, i32) {
    %c0_i32 = arith.constant 0 : i32
    %c0_i32_0 = arith.constant 0 : i32
    return %c0_i32, %arg1 : i32, i32
  }
  func.func @transform_5(%arg0: i32, %arg1: i32) -> (i32, i32) {
    %c0_i32 = arith.constant 0 : i32
    return %arg0, %arg1 : i32, i32
  }
}

</mosaic_0001>

<bundles_post_ra>
// kernel: tpu_custom_call.1
= control target key start
LH: loop header
LB: loop body
LE: loop exit
PB: predicated region body
PF: predicated region fallthrough
CT: control target
= control target key end

     0   :  { %6 = vsyncpa [#allocation3], 0  ;;  %s114_s0 = inlined_call_operand.hbm [shape: f32[8,128], index: 0, kind: input, shape index: {}]   ;;  %s115_s1 = inlined_call_operand.hbm [shape: f32[8,128], index: 1, kind: output, shape index: {}]  }
   0x1   :  { %7 = vsyncpa [#allocation4], 0  ;;  %s13_s8 = sshll.u32 %s114_s0, 4  ;;  %s96_s9 = smov [#allocation2]   ;;  %s14_s8 = int_to_ptr.hbm [resolvable:$true] %s13_s8 }
   0x2   :  { %s15_s10 = sshll.u32 %s96_s9, 4  ;;  %s16_s10 = int_to_ptr.vmem [resolvable:$true] %s15_s10 }
   0x3   :  { %18 = dma.hbm_to_vmem [thread:$0]  %s14_s8, 128, %s16_s10, [#allocation3]  }
   0x4   :  { %92 = dma.done.wait [#allocation3], 128  }
   0x5   :  { %93 = vsyncadd [#allocation3], 4294967168  ;;  %s97_s11 = smov [#allocation5]   ;;  %s32_s15 = sshll.u32 %s115_s1, 4  ;;  %v23_v0 = vld [vmem:[#allocation2] sm:$0xff]  ;;  %s33_s15 = int_to_ptr.hbm [resolvable:$true] %s32_s15 }
   0x6   :  { %s30_s12 = sshll.u32 %s97_s11, 4  ;;  %24 = vst [vmem:[#allocation5] sm:$0xff] %v23_v0  ;;  %s31_s12 = int_to_ptr.vmem [resolvable:$true] %s30_s12 }
   0x7   :  { %35 = dma.vmem_to_hbm [thread:$0]  %s31_s12, 128, %s33_s15, [#allocation4]  }
   0x8   :  { %94 = dma.done.wait [#allocation4], 128  }
   0x9   :  { %95 = vsyncadd [#allocation4], 4294967168 }
   0xa   :  { %40 = vsyncpa [#allocation3], 1 }
   0xb   :  { %41 = vsyncpa [#allocation4], 1 }

// kernel: tpu_custom_call.1
= control target key start
LH: loop header
LB: loop body
LE: loop exit
PB: predicated region body
PF: predicated region fallthrough
CT: control target
= control target key end

     0   :  { %10 = vsyncpa [#allocation3], 0  ;;  %s390_s0 = inlined_call_operand.hbm [shape: f32[2,8], index: 0, kind: input, shape index: {}]   ;;  %s391_s1 = inlined_call_operand.hbm [shape: f32[2,12], index: 1, kind: input, shape index: {}]   ;;  %s392_s2 = inlined_call_operand.hbm [shape: f32[2,16], index: 2, kind: input, shape index: {}]   ;;  %s393_s3 = inlined_call_operand.hbm [shape: f32[8,16], index: 3, kind: input, shape index: {}]   ;;  %s394_s4 = inlined_call_operand.hbm [shape: f32[12,16], index: 4, kind: input, shape index: {}]   ;;  %s395_s5 = inlined_call_operand.hbm [shape: f32[2,16], index: 5, kind: output, shape index: {}]  }
   0x1   :  { %11 = vsyncpa [#allocation6], 0 }
   0x2   :  { %12 = vsyncpa [#allocation9], 0  ;;  %s30_s20 = sshll.u32 %s391_s1, 4  ;;  %s31_s20 = int_to_ptr.hbm [resolvable:$true] %s30_s20 }
   0x3   :  { %13 = vsyncpa [#allocation4], 0  ;;  %s334_s21 = smov [#allocation5]   ;;  %s52_s25 = sshll.u32 %s393_s3, 4  ;;  %s53_s25 = int_to_ptr.hbm [resolvable:$true] %s52_s25 }
   0x4   :  { %s32_s22 = sshll.u32 %s334_s21, 4  ;;  %s335_s26 = smov [#allocation8]   ;;  %s33_s22 = int_to_ptr.vmem [resolvable:$true] %s32_s22 }
   0x5   :  { %35 = dma.hbm_to_vmem [thread:$0]  %s31_s20, 32, %s33_s22, [#allocation6]  }
   0x6   :  { %s54_s27 = sshll.u32 %s335_s26, 4  ;;  %s19_s30 = sshll.u32 %s390_s0, 4  ;;  %s55_s27 = int_to_ptr.vmem [resolvable:$true] %s54_s27  ;;  %s20_s30 = int_to_ptr.hbm [resolvable:$true] %s19_s30 }
   0x7   :  { %57 = dma.hbm_to_vmem [thread:$0]  %s53_s25, 128, %s55_s27, [#allocation9]  }
   0x8   :  { %s41_s7 = sshll.u32 %s392_s2, 4  ;;  %s336_s8 = smov [#allocation2]   ;;  %s42_s7 = int_to_ptr.hbm [resolvable:$true] %s41_s7 }
   0x9   :  { %s21_s9 = sshll.u32 %s336_s8, 4  ;;  %s337_s3 = smov [#allocation7]   ;;  %s22_s9 = int_to_ptr.vmem [resolvable:$true] %s21_s9 }
   0xa   :  { %24 = dma.hbm_to_vmem [thread:$0]  %s20_s30, 32, %s22_s9, [#allocation3]  }
   0xb   :  { %s43_s10 = sshll.u32 %s337_s3, 4  ;;  %s62_s13 = sshll.u32 %s394_s4, 4  ;;  %s44_s10 = int_to_ptr.vmem [resolvable:$true] %s43_s10  ;;  %s63_s13 = int_to_ptr.hbm [resolvable:$true] %s62_s13 }
   0xc   :  { %46 = dma.hbm_to_vmem [thread:$0]  %s42_s7, 32, %s44_s10, [#allocation6]  }
   0xd   :  { %s338_s0 = smov [#allocation10]   ;;  %s339_s15 = smov 128  }
   0xe   :  { %s64_s14 = sshll.u32 %s338_s0, 4  ;;  %s340_s16 = smov 8   ;;  %s65_s14 = int_to_ptr.vmem [resolvable:$true] %s64_s14 }
   0xf   :  { %70 = dma.hbm_to_vmem [thread:$0]  %s63_s13, 256, %s65_s14, [#allocation9], %s339_s15, %s339_s15, %s340_s16  }
  0x10   :  { %326 = dma.done.wait [#allocation3], 32  }
  0x11   :  { %327 = vsyncadd [#allocation3], 4294967264 }
  0x12   :  { %328 = dma.done.wait [#allocation6], 64  }
  0x13   :  { %329 = vsyncadd [#allocation6], 4294967232 }
  0x14   :  { %330 = dma.done.wait [#allocation9], 384  }
  0x15   :  { %331 = vsyncadd [#allocation9], 4294966912  ;;  %vm100_vm0 = vcmask 1043456   ;;  %vm124_vm1 = vcmask 64512   ;;  %v95_v0 = vld [vmem:[#allocation10 + $0x8] sm:$0xf] }
  0x16   :  { %v94_v1 = vld [vmem:[#allocation10] sm:$0xff]  ;;  %v93_v2 = vld [vmem:[#allocation8] sm:$0xff]  ;;  %171 = vmatpush.msk.msra.mxu0 %vm100_vm0, %v95_v0  ;;  %v92_v3 = vld [vmem:[#allocation5] sm:$0x3]  ;;  %vm96_vm2 = vcmask 97280   ;;  %s341_s2 = smov [#allocation11]  }
  0x17   :  { %143 = vmatpush.msra.mxu1 %v93_v2  ;;  %v91_v4 = vld [vmem:[#allocation2] sm:$0x3]  ;;  %v148_v7 = vld [vmem:[#allocation7] sm:$0x3]  ;;  %s157_s4 = sshll.u32 %s341_s2, 4  ;;  %s159_s19 = sshll.u32 %s395_s5, 4  ;;  %s158_s4 = int_to_ptr.vmem [resolvable:$true] %s157_s4  ;;  %s160_s19 = int_to_ptr.hbm [resolvable:$true] %s159_s19 }
  0x18   :  { %173 = vmatmul.msk.f32.vlgmr.msra.gmra.mxu1 %vm124_vm1, %v91_v4  ;;  %119 = vmatpush.msra.mxu0 %v94_v1  ;;  %vm150_vm3 = vcmask 123904  }
  0x19   :  { %172 = vmatmul.msk.f32.vlgmr.msra.gmra.mxu0 %vm96_vm2, %v92_v3 }
  0x95   :  { %v145_v5 = vpop.f32.mrf.mxu1 }
  0x96   :  { %v121_v6 = vpop.f32.mrf.mxu0 }
  0x97   :  { %v146_v8 = vadd.f32 %v145_v5, %v121_v6 }
  0x99   :  { %v149_v9 = vsub.f32 %v148_v7, %v146_v8 }
  0x9b   :  { %151 = vst.msk [vmem:[#allocation11] sm:$0x3] %vm150_vm3, %v149_v9 }
  0x9c   :  { %162 = dma.vmem_to_hbm [thread:$0]  %s158_s4, 32, %s160_s19, [#allocation4]  }
  0x9d   :  { %332 = dma.done.wait [#allocation4], 32  }
  0x9e   :  { %333 = vsyncadd [#allocation4], 4294967264 }
  0x9f   :  { %167 = vsyncpa [#allocation3], 1 }
  0xa0   :  { %168 = vsyncpa [#allocation6], 1 }
  0xa1   :  { %169 = vsyncpa [#allocation9], 1 }
  0xa2   :  { %170 = vsyncpa [#allocation4], 1 }

</bundles_post_ra>
